<compile_context>
chip_gen: v7x
topology: tpu7x:2x2x1
jax: 0.10.0
libtpu: 0.0.40
codegen_flags: <defaults>
</compile_context>

<pallas_src>
import jax
import jax.numpy as jnp
from jax.experimental import pallas as pl
from jax.experimental.pallas import tpu as pltpu

LANE = 128      # lane width  (last dim)
SUBLANE = 8     # sublane width (second-to-last dim)


def _round_up(n, m):
    return ((n + m - 1) // m) * m


def _make_fused_kernel(num_layers, out_pads):
    """Build a fused kernel over `num_layers` binarized linear+activation layers.

    Kernel ref layout:
        refs[0]                       : x        (B_pad, in0_pad)  f32
        refs[1 + 2*i], refs[2 + 2*i]  : w_i, b_i (out_pad_i, in_pad_i), (1, out_pad_i)
        refs[1 + 2*L]                 : z slab   (B_pad, sum(out_pads)) f32
        refs[2 + 2*L]                 : a slab   (B_pad, sum(out_pads)) f32
    """
    offsets = [0]
    for p in out_pads:
        offsets.append(offsets[-1] + p)

    def kernel(*refs):
        x_ref = refs[0]
        z_ref = refs[1 + 2 * num_layers]
        a_ref = refs[2 + 2 * num_layers]

        # Raw input stays f32 (do not quantize the real-valued first-layer input).
        h = x_ref[...]
        for i in range(num_layers):
            w = refs[1 + 2 * i][...]          # pre-binarized +/-1 (0 in padding)
            b = refs[2 + 2 * i][...]          # (1, out_pad) f32
            # z = h @ w.T expressed as a transposed-RHS contraction:
            # contract last dim of h with last dim of w — no materialized transpose.
            z = jax.lax.dot_general(
                h, w,
                dimension_numbers=(((1,), (1,)), ((), ())),
                preferred_element_type=jnp.float32)
            z = z + b

            lo, hi = offsets[i], offsets[i + 1]       # static, 128-aligned slices
            z_ref[:, lo:hi] = z                       # pre-activation (hook 'linear_i')
            a = jnp.where(z >= 0.0, 1.0, -1.0)        # BinarySign: sign(0) -> +1
            a_ref[:, lo:hi] = a                       # activation (hook 'act_i')

            # +/-1 is exact in bf16 -> feed the next layer's MXU bf16 fast path.
            h = a.astype(jnp.bfloat16)

    return kernel


def init_params(key, n_inputs, hidden_layers, bias=True):
    """Parameter init matching the PyTorch __init__ shapes (W: (out, in), b: zeros)."""
    dims_in = [n_inputs] + list(hidden_layers)
    dims_out = list(hidden_layers) + [1]
    params = []
    for d_in, d_out in zip(dims_in, dims_out):
        key, wk = jax.random.split(key)
        w = jax.random.normal(wk, (d_out, d_in), dtype=jnp.float32) * 0.1
        b = jnp.zeros((1, d_out), dtype=jnp.float32)  # bias=False also yields zeros
        params.append((w, b))
    return params


def pack_params(params):
    """Binarize (sign, 0 -> +1) and zero-pad each layer's weight/bias ONCE.

    Padding columns are zero so padded activation lanes (which become +1 after
    sign(0)) contribute nothing to the next layer. Layer 0's weight stays f32
    (its input is the raw f32 x); later layers carry bf16 (+/-1 is exact).
    """
    packed, meta = [], []
    for i, (w, b) in enumerate(params):
        out_f, in_f = w.shape
        out_p, in_p = _round_up(out_f, LANE), _round_up(in_f, LANE)
        w_bin = jnp.where(w >= 0.0, 1.0, -1.0)
        w_pad = jnp.zeros((out_p, in_p), jnp.float32).at[:out_f, :in_f].set(w_bin)
        if i > 0:
            w_pad = w_pad.astype(jnp.bfloat16)
        b_row = jnp.reshape(b, (1, out_f)).astype(jnp.float32)
        b_pad = jnp.zeros((1, out_p), jnp.float32).at[:, :out_f].set(b_row)
        packed.append((w_pad, b_pad))
        meta.append((in_f, out_f, in_p, out_p))
    return packed, meta


def fully_binarized_forward(x, packed, meta):
    """Single fused pallas_call for the whole MLP.

    Returns (output, activations) where `activations` mirrors the PyTorch hooks:
        {'linear_i': pre-activation z_i, 'act_i': activation a_i}.
    """
    B, n_in = x.shape
    L = len(packed)
    B_pad = _round_up(B, SUBLANE)
    in0_pad = meta[0][2]
    x_pad = jnp.zeros((B_pad, in0_pad), jnp.float32).at[:B, :n_in].set(x)

    out_pads = [m[3] for m in meta]
    offsets = [0]
    for p in out_pads:
        offsets.append(offsets[-1] + p)
    total = offsets[-1]                      # multiple of 128 -> lane-dense outputs

    kernel = _make_fused_kernel(L, tuple(out_pads))

    vmem = pl.BlockSpec(memory_space=pltpu.MemorySpace.VMEM)
    flat_inputs = [x_pad]
    for w_pad, b_pad in packed:
        flat_inputs += [w_pad, b_pad]

    z_slab, a_slab = pl.pallas_call(
        kernel,
        out_shape=(
            jax.ShapeDtypeStruct((B_pad, total), jnp.float32),
            jax.ShapeDtypeStruct((B_pad, total), jnp.float32),
        ),
        in_specs=[vmem] * len(flat_inputs),
        out_specs=(vmem, vmem),
    )(*flat_inputs)

    activations = {}
    out = None
    for i, (_, out_f, _, _) in enumerate(meta):
        lo = offsets[i]
        activations[f"linear_{i}"] = z_slab[:B, lo:lo + out_f]
        activations[f"act_{i}"] = a_slab[:B, lo:lo + out_f]
        out = activations[f"act_{i}"]
    return out, activations


if __name__ == "__main__":
    # Small shapes consistent with the module: batch=8, n_inputs=32, hidden=[32, 16].
    key = jax.random.PRNGKey(0)
    key, xk = jax.random.split(key)

    n_inputs = 32
    hidden_layers = [32, 16]
    batch = 8

    x = jax.random.normal(xk, (batch, n_inputs), dtype=jnp.float32)
    params = init_params(key, n_inputs, hidden_layers, bias=True)
    packed, meta = pack_params(params)          # one-time wrapper-side binarize + pad

    out, acts = fully_binarized_forward(x, packed, meta)
    out = jax.block_until_ready(out)

    assert out.shape == (batch, 1)
    # Output of the final BinaryActivation must be exactly +/-1.
    assert bool(jnp.all(jnp.abs(out) == 1.0))

    # Sanity check the hook tensors against a pure-JAX reference of the module.
    h = x
    for i, (w, b) in enumerate(params):
        w_bin = jnp.where(w >= 0.0, 1.0, -1.0)
        z_ref = h @ w_bin.T + b
        assert acts[f"linear_{i}"].shape == z_ref.shape
        assert bool(jnp.allclose(acts[f"linear_{i}"], z_ref, atol=1e-4))
        h = jnp.where(z_ref >= 0.0, 1.0, -1.0)
        assert bool(jnp.all(jnp.abs(acts[f"act_{i}"]) == 1.0))

    print("KERNEL_OK")
</pallas_src>

<mosaic_0001>
module attributes {stable_mosaic.version = 11 : i64} {
  func.func @kernel(%arg0: memref<8x128xf32, #tpu.memory_space<vmem>>, %arg1: memref<128x128xf32, #tpu.memory_space<vmem>>, %arg2: memref<1x128xf32, #tpu.memory_space<vmem>>, %arg3: memref<128x128xbf16, #tpu.memory_space<vmem>>, %arg4: memref<1x128xf32, #tpu.memory_space<vmem>>, %arg5: memref<128x128xbf16, #tpu.memory_space<vmem>>, %arg6: memref<1x128xf32, #tpu.memory_space<vmem>>, %arg7: memref<8x384xf32, #tpu.memory_space<vmem>>, %arg8: memref<8x384xf32, #tpu.memory_space<vmem>>) attributes {dimension_semantics = [], scalar_prefetch = 0 : i64, scratch_operands = 0 : i64, tpu.core_type = #tpu.core_type<tc>} {
    %c0 = arith.constant 0 : index
    %c0_0 = arith.constant 0 : index
    %0 = vector.load %arg0[%c0, %c0_0] : memref<8x128xf32, #tpu.memory_space<vmem>>, vector<8x128xf32>
    %c0_1 = arith.constant 0 : index
    %c0_2 = arith.constant 0 : index
    %1 = vector.load %arg1[%c0_1, %c0_2] : memref<128x128xf32, #tpu.memory_space<vmem>>, vector<128x128xf32>
    %c0_3 = arith.constant 0 : index
    %c0_4 = arith.constant 0 : index
    %2 = vector.load %arg2[%c0_3, %c0_4] : memref<1x128xf32, #tpu.memory_space<vmem>>, vector<1x128xf32>
    %cst = arith.constant dense<0.000000e+00> : vector<8x128xf32>
    %3 = tpu.matmul %0, %1, %cst {dimension_numbers = #tpu.dot_dimension_numbers<[1], [1], [0], [0], [0, 0, 1, 0], [], []>} : vector<8x128xf32>, vector<128x128xf32>, vector<8x128xf32> -> vector<8x128xf32>
    %4 = vector.broadcast %2 : vector<1x128xf32> to vector<8x128xf32>
    %5 = arith.addf %3, %4 : vector<8x128xf32>
    %c0_5 = arith.constant 0 : index
    %c0_6 = arith.constant 0 : index
    %6 = vector.load %arg7[%c0_5, %c0_6] : memref<8x384xf32, #tpu.memory_space<vmem>>, vector<8x128xf32>
    tpu.vector_store %arg7[%c0_5, %c0_6], %5 {strides = array<i32>} : memref<8x384xf32, #tpu.memory_space<vmem>>, vector<8x128xf32>,
    %cst_7 = arith.constant 0.000000e+00 : f32
    %7 = vector.broadcast %cst_7 : f32 to vector<8x128xf32>
    %8 = arith.cmpf oge, %5, %7 : vector<8x128xf32>
    %cst_8 = arith.constant 1.000000e+00 : f32
    %cst_9 = arith.constant -1.000000e+00 : f32
    %9 = vector.broadcast %cst_8 : f32 to vector<8x128xf32>
    %10 = vector.broadcast %cst_9 : f32 to vector<8x128xf32>
    %11 = arith.select %8, %9, %10 : vector<8x128xi1>, vector<8x128xf32>
    %c0_10 = arith.constant 0 : index
    %c0_11 = arith.constant 0 : index
    %12 = vector.load %arg8[%c0_10, %c0_11] : memref<8x384xf32, #tpu.memory_space<vmem>>, vector<8x128xf32>
    tpu.vector_store %arg8[%c0_10, %c0_11], %11 {strides = array<i32>} : memref<8x384xf32, #tpu.memory_space<vmem>>, vector<8x128xf32>,
    %13 = arith.truncf %11 : vector<8x128xf32> to vector<8x128xbf16>
    %c0_12 = arith.constant 0 : index
    %c0_13 = arith.constant 0 : index
    %14 = vector.load %arg3[%c0_12, %c0_13] : memref<128x128xbf16, #tpu.memory_space<vmem>>, vector<128x128xbf16>
    %c0_14 = arith.constant 0 : index
    %c0_15 = arith.constant 0 : index
    %15 = vector.load %arg4[%c0_14, %c0_15] : memref<1x128xf32, #tpu.memory_space<vmem>>, vector<1x128xf32>
    %cst_16 = arith.constant dense<0.000000e+00> : vector<8x128xf32>
    %16 = tpu.matmul %13, %14, %cst_16 {dimension_numbers = #tpu.dot_dimension_numbers<[1], [1], [0], [0], [0, 0, 1, 0], [], []>} : vector<8x128xbf16>, vector<128x128xbf16>, vector<8x128xf32> -> vector<8x128xf32>
    %17 = vector.broadcast %15 : vector<1x128xf32> to vector<8x128xf32>
    %18 = arith.addf %16, %17 : vector<8x128xf32>
    %c0_17 = arith.constant 0 : index
    %c128 = arith.constant 128 : index
    %19 = vector.load %arg7[%c0_17, %c128] : memref<8x384xf32, #tpu.memory_space<vmem>>, vector<8x128xf32>
    tpu.vector_store %arg7[%c0_17, %c128], %18 {strides = array<i32>} : memref<8x384xf32, #tpu.memory_space<vmem>>, vector<8x128xf32>,
    %cst_18 = arith.constant 0.000000e+00 : f32
    %20 = vector.broadcast %cst_18 : f32 to vector<8x128xf32>
    %21 = arith.cmpf oge, %18, %20 : vector<8x128xf32>
    %cst_19 = arith.constant 1.000000e+00 : f32
    %cst_20 = arith.constant -1.000000e+00 : f32
    %22 = vector.broadcast %cst_19 : f32 to vector<8x128xf32>
    %23 = vector.broadcast %cst_20 : f32 to vector<8x128xf32>
    %24 = arith.select %21, %22, %23 : vector<8x128xi1>, vector<8x128xf32>
    %c0_21 = arith.constant 0 : index
    %c128_22 = arith.constant 128 : index
    %25 = vector.load %arg8[%c0_21, %c128_22] : memref<8x384xf32, #tpu.memory_space<vmem>>, vector<8x128xf32>
    tpu.vector_store %arg8[%c0_21, %c128_22], %24 {strides = array<i32>} : memref<8x384xf32, #tpu.memory_space<vmem>>, vector<8x128xf32>,
    %26 = arith.truncf %24 : vector<8x128xf32> to vector<8x128xbf16>
    %c0_23 = arith.constant 0 : index
    %c0_24 = arith.constant 0 : index
    %27 = vector.load %arg5[%c0_23, %c0_24] : memref<128x128xbf16, #tpu.memory_space<vmem>>, vector<128x128xbf16>
    %c0_25 = arith.constant 0 : index
    %c0_26 = arith.constant 0 : index
    %28 = vector.load %arg6[%c0_25, %c0_26] : memref<1x128xf32, #tpu.memory_space<vmem>>, vector<1x128xf32>
    %cst_27 = arith.constant dense<0.000000e+00> : vector<8x128xf32>
    %29 = tpu.matmul %26, %27, %cst_27 {dimension_numbers = #tpu.dot_dimension_numbers<[1], [1], [0], [0], [0, 0, 1, 0], [], []>} : vector<8x128xbf16>, vector<128x128xbf16>, vector<8x128xf32> -> vector<8x128xf32>
    %30 = vector.broadcast %28 : vector<1x128xf32> to vector<8x128xf32>
    %31 = arith.addf %29, %30 : vector<8x128xf32>
    %c0_28 = arith.constant 0 : index
    %c256 = arith.constant 256 : index
    %32 = vector.load %arg7[%c0_28, %c256] : memref<8x384xf32, #tpu.memory_space<vmem>>, vector<8x128xf32>
    tpu.vector_store %arg7[%c0_28, %c256], %31 {strides = array<i32>} : memref<8x384xf32, #tpu.memory_space<vmem>>, vector<8x128xf32>,
    %cst_29 = arith.constant 0.000000e+00 : f32
    %33 = vector.broadcast %cst_29 : f32 to vector<8x128xf32>
    %34 = arith.cmpf oge, %31, %33 : vector<8x128xf32>
    %cst_30 = arith.constant 1.000000e+00 : f32
    %cst_31 = arith.constant -1.000000e+00 : f32
    %35 = vector.broadcast %cst_30 : f32 to vector<8x128xf32>
    %36 = vector.broadcast %cst_31 : f32 to vector<8x128xf32>
    %37 = arith.select %34, %35, %36 : vector<8x128xi1>, vector<8x128xf32>
    %c0_32 = arith.constant 0 : index
    %c256_33 = arith.constant 256 : index
    %38 = vector.load %arg8[%c0_32, %c256_33] : memref<8x384xf32, #tpu.memory_space<vmem>>, vector<8x128xf32>
    tpu.vector_store %arg8[%c0_32, %c256_33], %37 {strides = array<i32>} : memref<8x384xf32, #tpu.memory_space<vmem>>, vector<8x128xf32>,
    return
  }
}

</mosaic_0001>

<bundles_post_ra>
// kernel: tpu_custom_call.1
= control target key start
LH: loop header
LB: loop body
LE: loop exit
PB: predicated region body
PF: predicated region fallthrough
CT: control target
= control target key end

     0   :  { %14 = vsyncpa [#allocation3], 0  ;;  %s932_s0 = inlined_call_operand.hbm [shape: f32[8,128], index: 0, kind: input, shape index: {}]   ;;  %s933_s1 = inlined_call_operand.hbm [shape: f32[128,128], index: 1, kind: input, shape index: {}]   ;;  %s934_s2 = inlined_call_operand.vmem [shape: f32[1,128], index: 2, kind: input, shape index: {}]   ;;  %s935_s3 = inlined_call_operand.hbm [shape: bf16[128,128], index: 3, kind: input, shape index: {}]   ;;  %s936_s4 = inlined_call_operand.vmem [shape: f32[1,128], index: 4, kind: input, shape index: {}]   ;;  %s937_s5 = inlined_call_operand.hbm [shape: bf16[128,128], index: 5, kind: input, shape index: {}]   ;;  %s938_s6 = inlined_call_operand.vmem [shape: f32[1,128], index: 6, kind: input, shape index: {}]   ;;  %s939_s7 = inlined_call_operand.hbm [shape: f32[8,384], index: 7, kind: output, shape index: {0}]   ;;  %s940_s8 = inlined_call_operand.hbm [shape: f32[8,384], index: 8, kind: output, shape index: {1}]  }
   0x1   :  { %15 = vsyncpa [#allocation6], 0 }
   0x2   :  { %16 = vsyncpa [#allocation9], 0 }
   0x3   :  { %17 = vsyncpa [#allocation4], 0 }
   0x4   :  { %18 = vsyncpa [#allocation12], 0  ;;  %s770_s27 = smov [#allocation5]   ;;  %s628_s9 = scalar_lea.hbm %s933_s1, 2048 }
   0x5   :  { %s34_s28 = sshll.u32 %s770_s27, 4  ;;  %p629_p0 = scmp.ne.s32.totalorder %s933_s1, %s628_s9  ;;  %s35_s28 = int_to_ptr.vmem [resolvable:$true] %s34_s28 }
   0x6   :  { %p632_p1 = scmp.lt.u32.totalorder %s628_s9, %s933_s1 }
   0x8   :  { %p634_p2 = pnand %p632_p1, %p629_p0 }
   0xa   :  { %637 = shalt.err (!%p634_p2)
}
   0xb   :  { %s638_s14 = scalar_lea.vmem %s35_s28, 2048  ;;  %p643_p4 = scmp.lt.s32.totalorder %s35_s28, %s35_s28 }
   0xc   :  { %p639_p3 = scmp.ne.s32.totalorder %s35_s28, %s638_s14  ;;  %p644_p5 = scmp.lt.s32.totalorder %s638_s14, %s638_s14 }
   0xe   :  { %p645_p6 = por %p644_p5, %p643_p4 }
  0x10   :  { %p646_p7 = pnand %p645_p6, %p639_p3 }
  0x12   :  { %649 = shalt.err (!%p646_p7)
}
  0x13   :  { %s771_s15 = smov 128   ;;  %s772_s16 = smov 8  }
  0x14   :  { %40 = dma.hbm_to_vmem [thread:$0]  %s933_s1, 2048, %s35_s28, [#allocation6], %s771_s15, %s771_s15, %s772_s16  }
  0x15   :  { %s773_s19 = smov [#allocation2]   ;;  %s774_s21 = smov [#allocation7]  }
  0x16   :  { %s25_s20 = sshll.u32 %s773_s19, 4  ;;  %s48_s22 = sshll.u32 %s774_s21, 4  ;;  %s26_s20 = int_to_ptr.vmem [resolvable:$true] %s25_s20  ;;  %s49_s22 = int_to_ptr.vmem [resolvable:$true] %s48_s22 }
  0x17   :  { %s650_s25 = scalar_lea.hbm %s932_s0, 128 }
  0x18   :  { %p651_p8 = scmp.ne.s32.totalorder %s932_s0, %s650_s25  ;;  %p654_p9 = scmp.lt.u32.totalorder %s650_s25, %s932_s0 }
  0x1a   :  { %p656_p10 = pnand %p654_p9, %p651_p8 }
  0x1c   :  { %659 = shalt.err (!%p656_p10)
}
  0x1d   :  { %s660_s1 = scalar_lea.vmem %s26_s20, 128  ;;  %p665_p12 = scmp.lt.s32.totalorder %s26_s20, %s26_s20 }
  0x1e   :  { %p661_p11 = scmp.ne.s32.totalorder %s26_s20, %s660_s1  ;;  %p666_p13 = scmp.lt.s32.totalorder %s660_s1, %s660_s1 }
  0x20   :  { %p667_p0 = por %p666_p13, %p665_p12 }
  0x22   :  { %p668_p1 = pnand %p667_p0, %p661_p11 }
  0x24   :  { %671 = shalt.err (!%p668_p1)
}
  0x25   :  { %28 = dma.hbm_to_vmem [thread:$0]  %s932_s0, 128, %s26_s20, [#allocation3]  }
  0x26   :  { %s672_s12 = scalar_lea.hbm %s935_s3, 1024 }
  0x27   :  { %p673_p2 = scmp.ne.s32.totalorder %s935_s3, %s672_s12  ;;  %p676_p3 = scmp.lt.u32.totalorder %s672_s12, %s935_s3 }
  0x29   :  { %p678_p4 = pnand %p676_p3, %p673_p2 }
  0x2b   :  { %681 = shalt.err (!%p678_p4)
}
  0x2c   :  { %s682_s17 = scalar_lea.vmem %s49_s22, 1024  ;;  %p687_p6 = scmp.lt.s32.totalorder %s49_s22, %s49_s22 }
  0x2d   :  { %p683_p5 = scmp.ne.s32.totalorder %s49_s22, %s682_s17  ;;  %p688_p7 = scmp.lt.s32.totalorder %s682_s17, %s682_s17 }
  0x2f   :  { %p689_p8 = por %p688_p7, %p687_p6 }
  0x31   :  { %p690_p9 = pnand %p689_p8, %p683_p5 }
  0x33   :  { %693 = shalt.err (!%p690_p9)
}
  0x34   :  { %s775_s0 = smov 64   ;;  %s776_s18 = smov 4  }
  0x35   :  { %54 = dma.hbm_to_vmem [thread:$0]  %s935_s3, 1024, %s49_s22, [#allocation6], %s775_s0, %s775_s0, %s776_s18  }
  0x36   :  { %s777_s21 = smov [#allocation8]   ;;  %s694_s26 = scalar_lea.hbm %s937_s5, 1024 }
  0x37   :  { %s62_s23 = sshll.u32 %s777_s21, 4  ;;  %p695_p10 = scmp.ne.s32.totalorder %s937_s5, %s694_s26  ;;  %s63_s23 = int_to_ptr.vmem [resolvable:$true] %s62_s23 }
  0x38   :  { %p698_p11 = scmp.lt.u32.totalorder %s694_s26, %s937_s5 }
  0x3a   :  { %p700_p12 = pnand %p698_p11, %p695_p10 }
  0x3c   :  { %703 = shalt.err (!%p700_p12)
}
  0x3d   :  { %s704_s28 = scalar_lea.vmem %s63_s23, 1024  ;;  %p709_p0 = scmp.lt.s32.totalorder %s63_s23, %s63_s23 }
  0x3e   :  { %p705_p13 = scmp.ne.s32.totalorder %s63_s23, %s704_s28  ;;  %p710_p1 = scmp.lt.s32.totalorder %s704_s28, %s704_s28 }
  0x40   :  { %p711_p2 = por %p710_p1, %p709_p0 }
  0x42   :  { %p712_p3 = pnand %p711_p2, %p705_p13 }
  0x44   :  { %715 = shalt.err (!%p712_p3)
}
  0x45   :  { %68 = dma.hbm_to_vmem [thread:$0]  %s937_s5, 1024, %s63_s23, [#allocation9], %s775_s0, %s775_s0, %s776_s18  }
  0x46   :  { %760 = dma.done.wait [#allocation3], 128  }
  0x47   :  { %761 = vsyncadd [#allocation3], 4294967168 }
  0x48   :  { %762 = dma.done.wait [#allocation6], 3072  }
  0x49   :  { %763 = vsyncadd [#allocation6], 4294964224 }
  0x4a   :  { %764 = dma.done.wait [#allocation9], 1024  }
  0x4b   :  { %765 = vsyncadd [#allocation9], 4294966272  ;;  %v778_v0 = vmov 0.0|0.0   ;;  %vm779_vm0 = vmmov 0   ;;  %v780_v1 = vmov 0.0   ;;  %v85_v2 = vld [vmem:[#allocation5] sm:$0xff] }
  0x4c   :  { %574 = vmatprep.subr.bf16.mxu0 %v778_v0  ;;  %531 = vmatprep.mubr.msk.f32.mxu0 %vm779_vm0, %v780_v1  ;;  %v86_v3 = vld [vmem:[#allocation5 + $0x8] sm:$0xff]  ;;  %v87_v5 = vld [vmem:[#allocation5 + $0x10] sm:$0xff]  ;;  %v88_v6 = vld [vmem:[#allocation5 + $0x18] sm:$0xff]  ;;  %v781_v46 = vmov -1.0   ;;  %s782_s13 = smov [#allocation10]   ;;  %s783_s15 = smov [#allocation11]  }
  0x4d   :  { %534 = vmatprep.subr.bf16.mxu1 %v780_v1  ;;  %550 = vmatprep.mubr.msk.bf16.mxu1 %vm779_vm0, %v780_v1  ;;  %v575_v4 = vpack.c.bf16 %v86_v3, %v85_v2  ;;  %v612_v7 = vld [vmem:[#allocation7] sm:$0xff]   ;;  %v578_v8 = vpack.c.bf16 %v88_v6, %v87_v5  ;;  %v90_v10 = vld [vmem:[#allocation5 + $0x28] sm:$0xff]  ;;  %v91_v13 = vld [vmem:[#allocation5 + $0x30] sm:$0xff]  ;;  %s420_s14 = sshll.u32 %s782_s13, 4  ;;  %s421_s14 = int_to_ptr.vmem [resolvable:$true] %s420_s14 }
  0x4e   :  { %535 = vmatpush3.bf16.xpose.msra.mxu1 %v612_v7  ;;  %v89_v9 = vld [vmem:[#allocation5 + $0x20] sm:$0xff]  ;;  %v613_v11 = vld [vmem:[#allocation7 + $0x8] sm:$0xff]   ;;  %v92_v14 = vld [vmem:[#allocation5 + $0x38] sm:$0xff]  ;;  %s716_s16 = scalar_lea.vmem %s421_s14, 384  ;;  %p721_p5 = scmp.lt.s32.totalorder %s421_s14, %s421_s14 }
  0x4f   :  { %576 = vmatpush3.bf16.xpose.msra.mxu0 %v575_v4  ;;  %536 = vmatprep.subr.bf16.mxu1 %v780_v1  ;;  %v581_v12 = vpack.c.bf16 %v90_v10, %v89_v9  ;;  %v614_v15 = vld [vmem:[#allocation7 + $0x10] sm:$0xff]   ;;  %v584_v16 = vpack.c.bf16 %v92_v14, %v91_v13  ;;  %v93_v17 = vld [vmem:[#allocation5 + $0x40] sm:$0xff]  ;;  %v94_v18 = vld [vmem:[#allocation5 + $0x48] sm:$0xff]  ;;  %p717_p4 = scmp.ne.s32.totalorder %s421_s14, %s716_s16  ;;  %p722_p6 = scmp.lt.s32.totalorder %s716_s16, %s716_s16 }
  0x50   :  { %577 = vmatprep.subr.bf16.mxu0 %v778_v0  ;;  %v615_v19 = vld [vmem:[#allocation7 + $0x18] sm:$0xff]   ;;  %v587_v20 = vpack.c.bf16 %v94_v18, %v93_v17  ;;  %v95_v21 = vld [vmem:[#allocation5 + $0x50] sm:$0xff]  ;;  %v616_v23 = vld [vmem:[#allocation7 + $0x20] sm:$0xff]  }
  0x51   :  { %v96_v22 = vld [vmem:[#allocation5 + $0x58] sm:$0xff]  ;;  %v97_v25 = vld [vmem:[#allocation5 + $0x60] sm:$0xff]  ;;  %v98_v26 = vld [vmem:[#allocation5 + $0x68] sm:$0xff]  ;;  %p723_p7 = por %p722_p6, %p721_p5 }
  0x52   :  { %v590_v24 = vpack.c.bf16 %v96_v22, %v95_v21  ;;  %v617_v27 = vld [vmem:[#allocation7 + $0x28] sm:$0xff]   ;;  %v593_v28 = vpack.c.bf16 %v98_v26, %v97_v25  ;;  %v99_v29 = vld [vmem:[#allocation5 + $0x70] sm:$0xff]  ;;  %v100_v30 = vld [vmem:[#allocation5 + $0x78] sm:$0xff] }
  0x53   :  { %v618_v31 = vld [vmem:[#allocation7 + $0x30] sm:$0xff]   ;;  %v596_v32 = vpack.c.bf16 %v100_v30, %v99_v29  ;;  %v84_v33 = vld [vmem:[#allocation2] sm:$0xff]  ;;  %v620_v35 = vld [vmem:[#allocation8] sm:$0xff]   ;;  %p724_p8 = pnand %p723_p7, %p717_p4 }
  0x54   :  { %v619_v34 = vld [vmem:[#allocation7 + $0x38] sm:$0xff]   ;;  %v621_v36 = vld [vmem:[#allocation8 + $0x8] sm:$0xff]   ;;  %v622_v37 = vld [vmem:[#allocation8 + $0x10] sm:$0xff]  }
  0x55   :  { %v623_v38 = vld [vmem:[#allocation8 + $0x18] sm:$0xff]   ;;  %v624_v39 = vld [vmem:[#allocation8 + $0x20] sm:$0xff]   ;;  %v625_v40 = vld [vmem:[#allocation8 + $0x28] sm:$0xff]  }
  0x56   :  { %537 = vmatpush3.bf16.xpose.msra.mxu1 %v613_v11  ;;  %v626_v41 = vld [vmem:[#allocation8 + $0x30] sm:$0xff]   ;;  %v445_v42 = vld [vmem:[%s934_s2] ss:$0 sm:$0xff] }
  0x57   :  { %579 = vmatpush3.bf16.xpose.msra.mxu0 %v578_v8  ;;  %538 = vmatprep.subr.bf16.mxu1 %v780_v1  ;;  %v627_v49 = vld [vmem:[#allocation8 + $0x38] sm:$0xff]  }
  0x58   :  { %580 = vmatprep.subr.bf16.mxu0 %v778_v0  ;;  %v446_v50 = vld [vmem:[%s936_s4] ss:$0 sm:$0xff]  ;;  %s430_s4 = sshll.u32 %s783_s15, 4  ;;  %s431_s4 = int_to_ptr.vmem [resolvable:$true] %s430_s4 }
  0x59   :  { %v455_v58 = vld [vmem:[%s938_s6] ss:$0 sm:$0xff] }
  0x5e   :  { %539 = vmatpush3.bf16.xpose.msra.mxu1 %v614_v15 }
  0x5f   :  { %582 = vmatpush3.bf16.xpose.msra.mxu0 %v581_v12  ;;  %540 = vmatprep.subr.bf16.mxu1 %v780_v1 }
  0x60   :  { %583 = vmatprep.subr.bf16.mxu0 %v778_v0 }
  0x66   :  { %541 = vmatpush3.bf16.xpose.msra.mxu1 %v615_v19 }
  0x67   :  { %585 = vmatpush3.bf16.xpose.msra.mxu0 %v584_v16  ;;  %542 = vmatprep.subr.bf16.mxu1 %v780_v1 }
  0x68   :  { %586 = vmatprep.subr.bf16.mxu0 %v778_v0 }
  0x6e   :  { %543 = vmatpush3.bf16.xpose.msra.mxu1 %v616_v23 }
  0x6f   :  { %588 = vmatpush3.bf16.xpose.msra.mxu0 %v587_v20  ;;  %544 = vmatprep.subr.bf16.mxu1 %v780_v1 }
  0x70   :  { %589 = vmatprep.subr.bf16.mxu0 %v778_v0 }
  0x76   :  { %545 = vmatpush3.bf16.xpose.msra.mxu1 %v617_v27 }
  0x77   :  { %591 = vmatpush3.bf16.xpose.msra.mxu0 %v590_v24  ;;  %546 = vmatprep.subr.bf16.mxu1 %v780_v1 }
  0x78   :  { %592 = vmatprep.subr.bf16.mxu0 %v778_v0 }
  0x7e   :  { %547 = vmatpush3.bf16.xpose.msra.mxu1 %v618_v31 }
  0x7f   :  { %594 = vmatpush3.bf16.xpose.msra.mxu0 %v593_v28  ;;  %548 = vmatprep.subr.bf16.mxu1 %v780_v1 }
  0x80   :  { %595 = vmatprep.subr.bf16.mxu0 %v778_v0 }
  0x86   :  { %549 = vmatpush3.bf16.xpose.msra.mxu1 %v619_v34 }
  0x87   :  { %597 = vmatpush3.bf16.xpose.msra.mxu0 %v596_v32 }
  0x88   :  { %554 = vmatprep.subr.bf16.mxu0 %v780_v1 }
  0x8e   :  { %532 = vmatmul.mubr.f32.vlgmr.msra.gmra.mrb[0].mxu0 %v84_v33 }
  0x8f   :  { %570 = vmatprep.mubr.msk.bf16.mxu0 %vm779_vm0, %v780_v1  ;;  %555 = vmatpush3.bf16.xpose.msra.mxu0 %v620_v35 }
  0x90   :  { %556 = vmatprep.subr.bf16.mxu0 %v780_v1 }
  0x97   :  { %557 = vmatpush3.bf16.xpose.msra.mxu0 %v621_v36 }
  0x98   :  { %558 = vmatprep.subr.bf16.mxu0 %v780_v1 }
  0x9f   :  { %559 = vmatpush3.bf16.xpose.msra.mxu0 %v622_v37 }
  0xa0   :  { %560 = vmatprep.subr.bf16.mxu0 %v780_v1 }
  0xa7   :  { %561 = vmatpush3.bf16.xpose.msra.mxu0 %v623_v38 }
  0xa8   :  { %562 = vmatprep.subr.bf16.mxu0 %v780_v1 }
  0xaf   :  { %563 = vmatpush3.bf16.xpose.msra.mxu0 %v624_v39 }
  0xb0   :  { %564 = vmatprep.subr.bf16.mxu0 %v780_v1 }
  0xb7   :  { %565 = vmatpush3.bf16.xpose.msra.mxu0 %v625_v40 }
  0xb8   :  { %566 = vmatprep.subr.bf16.mxu0 %v780_v1 }
  0xbf   :  { %567 = vmatpush3.bf16.xpose.msra.mxu0 %v626_v41 }
  0xc0   :  { %568 = vmatprep.subr.bf16.mxu0 %v780_v1 }
  0xc7   :  { %569 = vmatpush3.bf16.xpose.msra.mxu0 %v627_v49 }
 0x161   :  { %v174_v43 = vpop.f32.mrb[0].mxu0 }
 0x162   :  { %v175_v44 = vadd.f32 %v445_v42, %v174_v43  ;;  %v533_v45 = vpop.f32.mrb[1].mxu0 }
 0x164   :  { %178 = vst [vmem:[#allocation10] sm:$0xff] %v175_v44  ;;  %vm179_vm1 = vcmp.ge.f32.partialorder %v175_v44, 0.0 }
 0x165   :  { %v180_v47 = vsel %vm179_vm1, 1.0, %v781_v46 }
 0x166   :  { %181 = vst [vmem:[#allocation11] sm:$0xff] %v180_v47  ;;  %v182_v48 = vpack.c.bf16 %v180_v47, %v180_v47 }
 0x168   :  { %551 = vmatmul.mubr.bf16.vlgmr.msra.gmra.mrb[0].mxu1 %v182_v48 }
 0x23b   :  { %v288_v51 = vpop.f32.mrb[0].mxu1 }
 0x23c   :  { %v289_v52 = vadd.f32 %v446_v50, %v288_v51  ;;  %v552_v53 = vpop.f32.mrb[1].mxu1 }
 0x23d   :  { %v291_v54 = vpop.f32.mrb[2].mxu1 }
 0x23e   :  { %294 = vst [vmem:[#allocation10 + $0x8] sm:$0xff] %v289_v52  ;;  %vm295_vm2 = vcmp.ge.f32.partialorder %v289_v52, 0.0  ;;  %v553_v55 = vpop.f32.mrb[3].mxu1 }
 0x23f   :  { %v296_v56 = vsel %vm295_vm2, 1.0, %v781_v46 }
 0x240   :  { %297 = vst [vmem:[#allocation11 + $0x8] sm:$0xff] %v296_v56  ;;  %v298_v57 = vpack.c.bf16 %v296_v56, %v296_v56 }
 0x242   :  { %571 = vmatmul.mubr.bf16.vlgmr.msra.gmra.mrb[4].mxu0 %v298_v57 }
 0x315   :  { %v404_v59 = vpop.f32.mrb[4].mxu0 }
 0x316   :  { %v405_v60 = vadd.f32 %v455_v58, %v404_v59  ;;  %v572_v61 = vpop.f32.mrb[5].mxu0 }
 0x317   :  { %v407_v62 = vpop.f32.mrb[6].mxu0 }
 0x318   :  { %410 = vst [vmem:[#allocation10 + $0x10] sm:$0xff] %v405_v60  ;;  %vm411_vm3 = vcmp.ge.f32.partialorder %v405_v60, 0.0  ;;  %v573_v63 = vpop.f32.mrb[7].mxu0 }
 0x319   :  { %v412_v0 = vsel %vm411_vm3, 1.0, %v781_v46 }
 0x31a   :  { %727 = shalt.err (!%p724_p8)
}
 0x31b   :  { %s728_s0 = scalar_lea.hbm %s939_s7, 384 }
 0x31c   :  { %p729_p9 = scmp.ne.s32.totalorder %s939_s7, %s728_s0  ;;  %p732_p10 = scmp.lt.u32.totalorder %s728_s0, %s939_s7 }
 0x31e   :  { %p734_p11 = pnand %p732_p10, %p729_p9 }
 0x320   :  { %737 = shalt.err (!%p734_p11)
}
 0x321   :  { %423 = dma.vmem_to_hbm [thread:$0]  %s421_s14, 384, %s939_s7, [#allocation4]   ;;  %413 = vst [vmem:[#allocation11 + $0x10] sm:$0xff] %v412_v0 }
 0x322   :  { %s738_s25 = scalar_lea.vmem %s431_s4, 384  ;;  %p743_p13 = scmp.lt.s32.totalorder %s431_s4, %s431_s4 }
 0x323   :  { %p739_p12 = scmp.ne.s32.totalorder %s431_s4, %s738_s25  ;;  %p744_p0 = scmp.lt.s32.totalorder %s738_s25, %s738_s25 }
 0x325   :  { %p745_p1 = por %p744_p0, %p743_p13 }
 0x327   :  { %p746_p2 = pnand %p745_p1, %p739_p12 }
 0x329   :  { %749 = shalt.err (!%p746_p2)
}
 0x32a   :  { %s750_s29 = scalar_lea.hbm %s940_s8, 384 }
 0x32b   :  { %p751_p3 = scmp.ne.s32.totalorder %s940_s8, %s750_s29  ;;  %p754_p4 = scmp.lt.u32.totalorder %s750_s29, %s940_s8 }
 0x32d   :  { %p756_p5 = pnand %p754_p4, %p751_p3 }
 0x32f   :  { %759 = shalt.err (!%p756_p5)
}
 0x330   :  { %433 = dma.vmem_to_hbm [thread:$0]  %s431_s4, 384, %s940_s8, [#allocation12]  }
 0x331   :  { %766 = dma.done.wait [#allocation4], 384  }
 0x332   :  { %767 = vsyncadd [#allocation4], 4294966912 }
 0x333   :  { %768 = dma.done.wait [#allocation12], 384  }
 0x334   :  { %769 = vsyncadd [#allocation12], 4294966912 }
 0x335   :  { %440 = vsyncpa [#allocation3], 1 }
 0x336   :  { %441 = vsyncpa [#allocation6], 1 }
 0x337   :  { %442 = vsyncpa [#allocation9], 1 }
 0x338   :  { %443 = vsyncpa [#allocation4], 1 }
 0x339   :  { %444 = vsyncpa [#allocation12], 1 }

</bundles_post_ra>
